<compile_context>
chip_gen: v7x
topology: tpu7x:2x2x1
jax: 0.10.0
libtpu: 0.0.40
codegen_flags: <defaults>
</compile_context>

<pallas_src>
import functools
import math

import jax
import jax.numpy as jnp
from jax import lax
from jax.experimental import pallas as pl
from jax.experimental.pallas import tpu as pltpu

# --- small synthetic config consistent with the module structure -------------
VOCAB_SIZE = 8                       # config.vocab_size
NUM_ION = 2                          # config.num_ion
NUM_UNITS = 32                       # config.num_units
C_IN = VOCAB_SIZE * NUM_ION + 1      # 17
BN_EPS = 1e-5


def _cdiv(a, b):
    return -(-a // b)


def _round_up(a, b):
    return _cdiv(a, b) * b


# ----------------------------- Pallas kernel ---------------------------------
def tnet_kernel(x_ref,
                w1_ref, b1_ref, w2_ref, b2_ref, w3_ref, b3_ref,
                w4_ref, b4_ref, w5_ref, b5_ref, wo_ref, bo_ref,
                o_ref, *, b_blk, n, compute_dtype):
    # x_ref: [b_blk * n, C_IN] -- rows are consecutive (batch, position) pairs
    # for b_blk batch elements; BN already folded into the weights.
    cd = compute_dtype
    x = x_ref[...]                      # already in compute dtype

    # conv1/conv2/conv3 (1x1) + folded BN + relu as big row-blocked matmuls.
    # MXU inputs are `cd` (bf16 in production); accumulate/bias/relu in f32.
    h = jnp.dot(x, w1_ref[...], preferred_element_type=jnp.float32) + b1_ref[...]
    h = jnp.maximum(h, 0.0)
    h = jnp.dot(h.astype(cd), w2_ref[...], preferred_element_type=jnp.float32) + b2_ref[...]
    h = jnp.maximum(h, 0.0)
    h = jnp.dot(h.astype(cd), w3_ref[...], preferred_element_type=jnp.float32) + b3_ref[...]
    h = jnp.maximum(h, 0.0)

    # torch.max(x, dim=2): max over the N positions of each batch element (f32).
    feat = h.shape[-1]                                   # 4 * num_units (lanes)
    pooled = jnp.max(h.reshape(b_blk, n, feat), axis=1)  # [b_blk, 4U]

    # fc1 + bn4 + relu, fc2 + bn5 + relu -- whole block at once.
    f = jnp.dot(pooled.astype(cd), w4_ref[...], preferred_element_type=jnp.float32) + b4_ref[...]
    f = jnp.maximum(f, 0.0)
    f = jnp.dot(f.astype(cd), w5_ref[...], preferred_element_type=jnp.float32) + b5_ref[...]
    f = jnp.maximum(f, 0.0)

    # output_layer, emitted batch-last ([V, b_blk]): lane-dense store (full
    # [8,128] vregs) instead of masked 8-of-128-lane stores.
    logits_t = lax.dot_general(
        wo_ref[...], f.astype(cd),
        dimension_numbers=(((1,), (1,)), ((), ())),
        preferred_element_type=jnp.float32)              # [V, b_blk]
    o_ref[...] = logits_t + bo_ref[...]


# ----------------------------- wrapper / glue ---------------------------------
def _tensorcores_per_device():
    """Best-effort TensorCores-per-Pallas-device (megacore / dual-TC chips)."""
    try:
        kind = jax.devices()[0].device_kind.lower()
    except Exception:
        return 1
    if any(tag in kind for tag in ("v4", "v5p", "v7", "7x")):
        return 2
    return 1


def _choose_batch_block(B, N, num_cores, target_rows):
    """Pick a batch block size and block count.

    * b_blk*N rows per block stays a multiple of 16 (bf16 sublane tile).
    * Single-TC chips: as few / as large blocks as fit target_rows.
    * Multi-TC chips: block count is a multiple of num_cores, rows capped.
    B is padded up to b_blk * n_blocks by the caller (garbage rows sliced off).
    """
    unit = max(1, 16 // math.gcd(N, 16))
    blk_cap = max(unit, (max(target_rows, N) // N) // unit * unit)
    if num_cores <= 1:
        b_blk = min(_round_up(B, unit), blk_cap)
        n_blocks = _cdiv(B, b_blk)
    else:
        n_blocks = _round_up(max(num_cores, _cdiv(B * N, target_rows)), num_cores)
        b_blk = min(_round_up(_cdiv(B, n_blocks), unit), blk_cap)
        n_blocks = _round_up(_cdiv(B, b_blk), num_cores)
    return b_blk, n_blocks


def tnet_forward(x_ncn, folded, *, compute_dtype=jnp.bfloat16,
                 target_rows=8192, num_cores=None):
    """x_ncn: [B, C_IN, N] (PyTorch NCW layout). Returns logits [B, VOCAB_SIZE]."""
    B, C, N = x_ncn.shape
    if num_cores is None:
        num_cores = _tensorcores_per_device()
    b_blk, n_blocks = _choose_batch_block(B, N, num_cores, target_rows)
    B_pad = b_blk * n_blocks

    # Pad batch (extra rows are garbage and sliced off), then a SINGLE fused
    # transpose + reshape + downcast pass NCW -> row-major [B_pad*N, C].
    if B_pad > B:
        x_ncn = jnp.pad(x_ncn, ((0, B_pad - B), (0, 0), (0, 0)))
    x2d = jnp.transpose(x_ncn, (0, 2, 1)).reshape(B_pad * N, C).astype(compute_dtype)

    weights = [w.astype(compute_dtype) for w in folded[0::2]]
    biases = [b.astype(jnp.float32) for b in folded[1::2]]
    V = weights[-1].shape[0]                    # output weight is [V, U]

    args = [x2d]
    in_specs = [pl.BlockSpec((b_blk * N, C), lambda i: (i, 0))]
    for w, bias in zip(weights, biases):
        # Constant index maps: fetched once, VMEM-resident across the grid.
        in_specs.append(pl.BlockSpec(w.shape, lambda i: (0, 0)))
        in_specs.append(pl.BlockSpec(bias.shape, lambda i: (0, 0)))
        args += [w, bias]

    kernel = functools.partial(tnet_kernel, b_blk=b_blk, n=N,
                               compute_dtype=compute_dtype)
    vmem_limit = (64 if num_cores <= 1 else 40) * 1024 * 1024
    out3 = pl.pallas_call(
        kernel,
        out_shape=jax.ShapeDtypeStruct((n_blocks, V, b_blk), jnp.float32),
        grid=(n_blocks,),
        in_specs=in_specs,
        out_specs=pl.BlockSpec((pl.Squeezed(), V, b_blk), lambda i: (i, 0, 0)),
        compiler_params=pltpu.CompilerParams(
            dimension_semantics=("parallel",),
            vmem_limit_bytes=vmem_limit),
    )(*args)
    # [n_blocks, V, b_blk] -> [B, V] -- tiny fix-up on the logits only.
    return jnp.transpose(out3, (0, 2, 1)).reshape(B_pad, V)[:B]


# ---------------------- deterministic parameter setup -------------------------
def init_raw_params(key):
    ks = iter(jax.random.split(key, 64))

    def w(shape, scale=0.2):
        return scale * jax.random.normal(next(ks), shape, dtype=jnp.float32)

    def bn(c):
        gamma = 1.0 + 0.1 * jax.random.normal(next(ks), (c,), dtype=jnp.float32)
        beta = 0.1 * jax.random.normal(next(ks), (c,), dtype=jnp.float32)
        mean = 0.1 * jax.random.normal(next(ks), (c,), dtype=jnp.float32)
        var = jax.random.uniform(next(ks), (c,), dtype=jnp.float32,
                                 minval=0.5, maxval=1.5)
        return gamma, beta, mean, var

    U = NUM_UNITS
    p = {}
    p["conv1_w"], p["conv1_b"] = w((U, C_IN)), w((U,))
    p["conv2_w"], p["conv2_b"] = w((2 * U, U)), w((2 * U,))
    p["conv3_w"], p["conv3_b"] = w((4 * U, 2 * U)), w((4 * U,))
    p["fc1_w"], p["fc1_b"] = w((2 * U, 4 * U)), w((2 * U,))
    p["fc2_w"], p["fc2_b"] = w((U, 2 * U)), w((U,))
    p["out_w"], p["out_b"] = w((VOCAB_SIZE, U)), w((VOCAB_SIZE,))
    p["bn_in"], p["bn1"], p["bn2"] = bn(C_IN), bn(U), bn(2 * U)
    p["bn3"], p["bn4"], p["bn5"] = bn(4 * U), bn(2 * U), bn(U)
    return p


def fold_params(p):
    """Fold inference-mode BatchNorms into the adjacent linear layers.

    Returns (W, b) pairs in f32; hidden layers use W:[C_in, C_out], b:[1, C_out];
    the output layer keeps W:[V, U], b:[V, 1] for the batch-last (lane-dense)
    kernel store."""
    def bn_affine(bn):
        g, b, m, v = bn
        s = g / jnp.sqrt(v + BN_EPS)
        return s, b - m * s

    s_in, t_in = bn_affine(p["bn_in"])
    s1, t1 = bn_affine(p["bn1"])
    s2, t2 = bn_affine(p["bn2"])
    s3, t3 = bn_affine(p["bn3"])
    s4, t4 = bn_affine(p["bn4"])
    s5, t5 = bn_affine(p["bn5"])

    W1T = p["conv1_w"].T                      # [C_IN, U]
    a1 = (s_in[:, None] * W1T) * s1[None, :]
    c1 = (t_in @ W1T + p["conv1_b"]) * s1 + t1

    a2 = p["conv2_w"].T * s2[None, :]
    c2 = p["conv2_b"] * s2 + t2
    a3 = p["conv3_w"].T * s3[None, :]
    c3 = p["conv3_b"] * s3 + t3
    a4 = p["fc1_w"].T * s4[None, :]
    c4 = p["fc1_b"] * s4 + t4
    a5 = p["fc2_w"].T * s5[None, :]
    c5 = p["fc2_b"] * s5 + t5
    ao = p["out_w"]                           # [V, U]
    co = p["out_b"].reshape(-1, 1)            # [V, 1]

    def r2(v):
        return v.reshape(1, -1)

    return (a1, r2(c1), a2, r2(c2), a3, r2(c3),
            a4, r2(c4), a5, r2(c5), ao, co)


# ----------------------------- pure-JAX reference -----------------------------
def tnet_ref(x_ncn, folded, compute_dtype=jnp.float32):
    """Mirrors the kernel's numeric recipe (cast-to-cd matmul inputs, f32 acc)."""
    a1, c1, a2, c2, a3, c3, a4, c4, a5, c5, ao, co = folded
    cd = compute_dtype

    def mm(h, w):
        return jnp.einsum("bnc,co->bno", h.astype(cd), w.astype(cd),
                          preferred_element_type=jnp.float32)

    x = jnp.transpose(x_ncn, (0, 2, 1)).astype(cd)          # [B, N, C]
    h = jax.nn.relu(mm(x, a1) + c1)
    h = jax.nn.relu(mm(h, a2) + c2)
    h = jax.nn.relu(mm(h, a3) + c3)
    pooled = jnp.max(h, axis=1)                              # [B, 4U] f32
    f = jax.nn.relu(jnp.dot(pooled.astype(cd), a4.astype(cd),
                            preferred_element_type=jnp.float32) + c4)
    f = jax.nn.relu(jnp.dot(f.astype(cd), a5.astype(cd),
                            preferred_element_type=jnp.float32) + c5)
    return jnp.dot(f.astype(cd), ao.astype(cd).T,
                   preferred_element_type=jnp.float32) + co.reshape(1, -1)


if __name__ == "__main__":
    key = jax.random.PRNGKey(0)
    k_x, k_p = jax.random.split(key)

    B, N = 4, 16                                  # (batch * T, N)
    x = jax.random.normal(k_x, (B, C_IN, N), dtype=jnp.float32)

    raw = init_raw_params(k_p)
    folded = fold_params(raw)

    ref_f32 = tnet_ref(x, folded, jnp.float32)

    # f32 path: exact check against the pure-JAX reference.
    out_f32 = jax.block_until_ready(tnet_forward(x, folded, compute_dtype=jnp.float32))
    assert out_f32.shape == (B, VOCAB_SIZE)
    assert jnp.allclose(out_f32, ref_f32, atol=1e-3, rtol=1e-3)

    # bf16 production path: tight check vs a reference with the identical
    # bf16-matmul / f32-accumulate recipe, loose sanity check vs pure f32.
    out_bf16 = jax.block_until_ready(tnet_forward(x, folded, compute_dtype=jnp.bfloat16))
    ref_bf16 = tnet_ref(x, folded, jnp.bfloat16)
    assert jnp.allclose(out_bf16, ref_bf16, atol=2e-3, rtol=2e-3)
    assert jnp.allclose(out_bf16, ref_f32, atol=5e-2, rtol=5e-2)

    # Odd batch size exercises the batch-padding path.
    x_odd = jax.random.normal(k_x, (3, C_IN, N), dtype=jnp.float32)
    out_odd = jax.block_until_ready(tnet_forward(x_odd, folded, compute_dtype=jnp.float32))
    assert jnp.allclose(out_odd, tnet_ref(x_odd, folded, jnp.float32),
                        atol=1e-3, rtol=1e-3)

    print("KERNEL_OK")
</pallas_src>

<mosaic_0001>
module attributes {stable_mosaic.version = 11 : i64} {
  func.func @tnet_kernel(%arg0: i32, %arg1: memref<64x17xf32, #tpu.memory_space<vmem>>, %arg2: memref<17x32xf32, #tpu.memory_space<vmem>>, %arg3: memref<1x32xf32, #tpu.memory_space<vmem>>, %arg4: memref<32x64xf32, #tpu.memory_space<vmem>>, %arg5: memref<1x64xf32, #tpu.memory_space<vmem>>, %arg6: memref<64x128xf32, #tpu.memory_space<vmem>>, %arg7: memref<1x128xf32, #tpu.memory_space<vmem>>, %arg8: memref<128x64xf32, #tpu.memory_space<vmem>>, %arg9: memref<1x64xf32, #tpu.memory_space<vmem>>, %arg10: memref<64x32xf32, #tpu.memory_space<vmem>>, %arg11: memref<1x32xf32, #tpu.memory_space<vmem>>, %arg12: memref<8x32xf32, #tpu.memory_space<vmem>>, %arg13: memref<8x1xf32, #tpu.memory_space<vmem>>, %arg14: memref<1x8x4xf32, #tpu.memory_space<vmem>>) attributes {dimension_semantics = [#tpu.dimension_semantics<parallel>], iteration_bounds = array<i64: 1>, scalar_prefetch = 0 : i64, scratch_operands = 0 : i64, tpu.core_type = #tpu.core_type<tc>, window_params = [{transform_indices = @transform_0, window_bounds = array<i64: 64, 17>}, {pipeline_mode = #tpu.pipeline_mode<synchronous>, transform_indices = @transform_1, window_bounds = array<i64: 17, 32>}, {pipeline_mode = #tpu.pipeline_mode<synchronous>, transform_indices = @transform_2, window_bounds = array<i64: 1, 32>}, {pipeline_mode = #tpu.pipeline_mode<synchronous>, transform_indices = @transform_3, window_bounds = array<i64: 32, 64>}, {pipeline_mode = #tpu.pipeline_mode<synchronous>, transform_indices = @transform_4, window_bounds = array<i64: 1, 64>}, {pipeline_mode = #tpu.pipeline_mode<synchronous>, transform_indices = @transform_5, window_bounds = array<i64: 64, 128>}, {pipeline_mode = #tpu.pipeline_mode<synchronous>, transform_indices = @transform_6, window_bounds = array<i64: 1, 128>}, {pipeline_mode = #tpu.pipeline_mode<synchronous>, transform_indices = @transform_7, window_bounds = array<i64: 128, 64>}, {pipeline_mode = #tpu.pipeline_mode<synchronous>, transform_indices = @transform_8, window_bounds = array<i64: 1, 64>}, {pipeline_mode = #tpu.pipeline_mode<synchronous>, transform_indices = @transform_9, window_bounds = array<i64: 64, 32>}, {pipeline_mode = #tpu.pipeline_mode<synchronous>, transform_indices = @transform_10, window_bounds = array<i64: 1, 32>}, {pipeline_mode = #tpu.pipeline_mode<synchronous>, transform_indices = @transform_11, window_bounds = array<i64: 8, 32>}, {pipeline_mode = #tpu.pipeline_mode<synchronous>, transform_indices = @transform_12, window_bounds = array<i64: 8, 1>}, {transform_indices = @transform_13, window_bounds = array<i64: 1, 8, 4>}]} {
    %c0 = arith.constant 0 : index
    %c0_0 = arith.constant 0 : index
    %0 = vector.load %arg1[%c0, %c0_0] : memref<64x17xf32, #tpu.memory_space<vmem>>, vector<64x17xf32>
    %c0_1 = arith.constant 0 : index
    %c0_2 = arith.constant 0 : index
    %1 = vector.load %arg2[%c0_1, %c0_2] : memref<17x32xf32, #tpu.memory_space<vmem>>, vector<17x32xf32>
    %cst = arith.constant dense<0.000000e+00> : vector<64x32xf32>
    %2 = tpu.matmul %0, %1, %cst {dimension_numbers = #tpu.dot_dimension_numbers<[1], [0], [0], [1], [0, 0, 1, 1], [], []>} : vector<64x17xf32>, vector<17x32xf32>, vector<64x32xf32> -> vector<64x32xf32>
    %c0_3 = arith.constant 0 : index
    %c0_4 = arith.constant 0 : index
    %3 = vector.load %arg3[%c0_3, %c0_4] : memref<1x32xf32, #tpu.memory_space<vmem>>, vector<1x32xf32>
    %4 = vector.broadcast %3 : vector<1x32xf32> to vector<64x32xf32>
    %5 = arith.addf %2, %4 : vector<64x32xf32>
    %cst_5 = arith.constant 0.000000e+00 : f32
    %6 = vector.broadcast %cst_5 : f32 to vector<64x32xf32>
    %7 = arith.maximumf %5, %6 : vector<64x32xf32>
    %c0_6 = arith.constant 0 : index
    %c0_7 = arith.constant 0 : index
    %8 = vector.load %arg4[%c0_6, %c0_7] : memref<32x64xf32, #tpu.memory_space<vmem>>, vector<32x64xf32>
    %cst_8 = arith.constant dense<0.000000e+00> : vector<64x64xf32>
    %9 = tpu.matmul %7, %8, %cst_8 {dimension_numbers = #tpu.dot_dimension_numbers<[1], [0], [0], [1], [0, 0, 1, 1], [], []>} : vector<64x32xf32>, vector<32x64xf32>, vector<64x64xf32> -> vector<64x64xf32>
    %c0_9 = arith.constant 0 : index
    %c0_10 = arith.constant 0 : index
    %10 = vector.load %arg5[%c0_9, %c0_10] : memref<1x64xf32, #tpu.memory_space<vmem>>, vector<1x64xf32>
    %11 = vector.broadcast %10 : vector<1x64xf32> to vector<64x64xf32>
    %12 = arith.addf %9, %11 : vector<64x64xf32>
    %cst_11 = arith.constant 0.000000e+00 : f32
    %13 = vector.broadcast %cst_11 : f32 to vector<64x64xf32>
    %14 = arith.maximumf %12, %13 : vector<64x64xf32>
    %c0_12 = arith.constant 0 : index
    %c0_13 = arith.constant 0 : index
    %15 = vector.load %arg6[%c0_12, %c0_13] : memref<64x128xf32, #tpu.memory_space<vmem>>, vector<64x128xf32>
    %cst_14 = arith.constant dense<0.000000e+00> : vector<64x128xf32>
    %16 = tpu.matmul %14, %15, %cst_14 {dimension_numbers = #tpu.dot_dimension_numbers<[1], [0], [0], [1], [0, 0, 1, 1], [], []>} : vector<64x64xf32>, vector<64x128xf32>, vector<64x128xf32> -> vector<64x128xf32>
    %c0_15 = arith.constant 0 : index
    %c0_16 = arith.constant 0 : index
    %17 = vector.load %arg7[%c0_15, %c0_16] : memref<1x128xf32, #tpu.memory_space<vmem>>, vector<1x128xf32>
    %18 = vector.broadcast %17 : vector<1x128xf32> to vector<64x128xf32>
    %19 = arith.addf %16, %18 : vector<64x128xf32>
    %cst_17 = arith.constant 0.000000e+00 : f32
    %20 = vector.broadcast %cst_17 : f32 to vector<64x128xf32>
    %21 = arith.maximumf %19, %20 : vector<64x128xf32>
    %22 = vector.shape_cast %21 : vector<64x128xf32> to vector<4x16x128xf32>
    %cst_18 = arith.constant dense<0xFF800000> : vector<4x128xf32>
    %23 = vector.multi_reduction <maximumf>, %22, %cst_18 [1] : vector<4x16x128xf32> to vector<4x128xf32>
    %c0_19 = arith.constant 0 : index
    %c0_20 = arith.constant 0 : index
    %24 = vector.load %arg8[%c0_19, %c0_20] : memref<128x64xf32, #tpu.memory_space<vmem>>, vector<128x64xf32>
    %cst_21 = arith.constant dense<0.000000e+00> : vector<4x64xf32>
    %25 = tpu.matmul %23, %24, %cst_21 {dimension_numbers = #tpu.dot_dimension_numbers<[1], [0], [0], [1], [0, 0, 1, 1], [], []>} : vector<4x128xf32>, vector<128x64xf32>, vector<4x64xf32> -> vector<4x64xf32>
    %c0_22 = arith.constant 0 : index
    %c0_23 = arith.constant 0 : index
    %26 = vector.load %arg9[%c0_22, %c0_23] : memref<1x64xf32, #tpu.memory_space<vmem>>, vector<1x64xf32>
    %27 = vector.broadcast %26 : vector<1x64xf32> to vector<4x64xf32>
    %28 = arith.addf %25, %27 : vector<4x64xf32>
    %cst_24 = arith.constant 0.000000e+00 : f32
    %29 = vector.broadcast %cst_24 : f32 to vector<4x64xf32>
    %30 = arith.maximumf %28, %29 : vector<4x64xf32>
    %c0_25 = arith.constant 0 : index
    %c0_26 = arith.constant 0 : index
    %31 = vector.load %arg10[%c0_25, %c0_26] : memref<64x32xf32, #tpu.memory_space<vmem>>, vector<64x32xf32>
    %cst_27 = arith.constant dense<0.000000e+00> : vector<4x32xf32>
    %32 = tpu.matmul %30, %31, %cst_27 {dimension_numbers = #tpu.dot_dimension_numbers<[1], [0], [0], [1], [0, 0, 1, 1], [], []>} : vector<4x64xf32>, vector<64x32xf32>, vector<4x32xf32> -> vector<4x32xf32>
    %c0_28 = arith.constant 0 : index
    %c0_29 = arith.constant 0 : index
    %33 = vector.load %arg11[%c0_28, %c0_29] : memref<1x32xf32, #tpu.memory_space<vmem>>, vector<1x32xf32>
    %34 = vector.broadcast %33 : vector<1x32xf32> to vector<4x32xf32>
    %35 = arith.addf %32, %34 : vector<4x32xf32>
    %cst_30 = arith.constant 0.000000e+00 : f32
    %36 = vector.broadcast %cst_30 : f32 to vector<4x32xf32>
    %37 = arith.maximumf %35, %36 : vector<4x32xf32>
    %c0_31 = arith.constant 0 : index
    %c0_32 = arith.constant 0 : index
    %38 = vector.load %arg12[%c0_31, %c0_32] : memref<8x32xf32, #tpu.memory_space<vmem>>, vector<8x32xf32>
    %cst_33 = arith.constant dense<0.000000e+00> : vector<8x4xf32>
    %39 = tpu.matmul %38, %37, %cst_33 {dimension_numbers = #tpu.dot_dimension_numbers<[1], [1], [0], [0], [0, 0, 1, 0], [], []>} : vector<8x32xf32>, vector<4x32xf32>, vector<8x4xf32> -> vector<8x4xf32>
    %c0_34 = arith.constant 0 : index
    %c0_35 = arith.constant 0 : index
    %40 = vector.load %arg13[%c0_34, %c0_35] : memref<8x1xf32, #tpu.memory_space<vmem>>, vector<8x1xf32>
    %41 = vector.broadcast %40 : vector<8x1xf32> to vector<8x4xf32>
    %42 = arith.addf %39, %41 : vector<8x4xf32>
    %c0_36 = arith.constant 0 : index
    %c0_37 = arith.constant 0 : index
    %c0_38 = arith.constant 0 : index
    %43 = vector.load %arg14[%c0_36, %c0_37, %c0_38] : memref<1x8x4xf32, #tpu.memory_space<vmem>>, vector<1x8x4xf32>
    %44 = vector.shape_cast %43 : vector<1x8x4xf32> to vector<8x4xf32>
    %45 = vector.shape_cast %42 : vector<8x4xf32> to vector<1x8x4xf32>
    tpu.vector_store %arg14[%c0_36, %c0_37, %c0_38], %45 {strides = array<i32>} : memref<1x8x4xf32, #tpu.memory_space<vmem>>, vector<1x8x4xf32>,
    return
  }
  func.func @transform_0(%arg0: i32) -> (i32, i32) {
    %c0_i32 = arith.constant 0 : i32
    %c0_i32_0 = arith.constant 0 : i32
    return %arg0, %c0_i32 : i32, i32
  }
  func.func @transform_1(%arg0: i32) -> (i32, i32) {
    %c0_i32 = arith.constant 0 : i32
    %c0_i32_0 = arith.constant 0 : i32
    %c0_i32_1 = arith.constant 0 : i32
    return %c0_i32, %c0_i32_0 : i32, i32
  }
  func.func @transform_2(%arg0: i32) -> (i32, i32) {
    %c0_i32 = arith.constant 0 : i32
    %c0_i32_0 = arith.constant 0 : i32
    %c0_i32_1 = arith.constant 0 : i32
    return %c0_i32, %c0_i32_0 : i32, i32
  }
  func.func @transform_3(%arg0: i32) -> (i32, i32) {
    %c0_i32 = arith.constant 0 : i32
    %c0_i32_0 = arith.constant 0 : i32
    %c0_i32_1 = arith.constant 0 : i32
    return %c0_i32, %c0_i32_0 : i32, i32
  }
  func.func @transform_4(%arg0: i32) -> (i32, i32) {
    %c0_i32 = arith.constant 0 : i32
    %c0_i32_0 = arith.constant 0 : i32
    %c0_i32_1 = arith.constant 0 : i32
    return %c0_i32, %c0_i32_0 : i32, i32
  }
  func.func @transform_5(%arg0: i32) -> (i32, i32) {
    %c0_i32 = arith.constant 0 : i32
    %c0_i32_0 = arith.constant 0 : i32
    %c0_i32_1 = arith.constant 0 : i32
    return %c0_i32, %c0_i32_0 : i32, i32
  }
  func.func @transform_6(%arg0: i32) -> (i32, i32) {
    %c0_i32 = arith.constant 0 : i32
    %c0_i32_0 = arith.constant 0 : i32
    %c0_i32_1 = arith.constant 0 : i32
    return %c0_i32, %c0_i32_0 : i32, i32
  }
  func.func @transform_7(%arg0: i32) -> (i32, i32) {
    %c0_i32 = arith.constant 0 : i32
    %c0_i32_0 = arith.constant 0 : i32
    %c0_i32_1 = arith.constant 0 : i32
    return %c0_i32, %c0_i32_0 : i32, i32
  }
  func.func @transform_8(%arg0: i32) -> (i32, i32) {
    %c0_i32 = arith.constant 0 : i32
    %c0_i32_0 = arith.constant 0 : i32
    %c0_i32_1 = arith.constant 0 : i32
    return %c0_i32, %c0_i32_0 : i32, i32
  }
  func.func @transform_9(%arg0: i32) -> (i32, i32) {
    %c0_i32 = arith.constant 0 : i32
    %c0_i32_0 = arith.constant 0 : i32
    %c0_i32_1 = arith.constant 0 : i32
    return %c0_i32, %c0_i32_0 : i32, i32
  }
  func.func @transform_10(%arg0: i32) -> (i32, i32) {
    %c0_i32 = arith.constant 0 : i32
    %c0_i32_0 = arith.constant 0 : i32
    %c0_i32_1 = arith.constant 0 : i32
    return %c0_i32, %c0_i32_0 : i32, i32
  }
  func.func @transform_11(%arg0: i32) -> (i32, i32) {
    %c0_i32 = arith.constant 0 : i32
    %c0_i32_0 = arith.constant 0 : i32
    %c0_i32_1 = arith.constant 0 : i32
    return %c0_i32, %c0_i32_0 : i32, i32
  }
  func.func @transform_12(%arg0: i32) -> (i32, i32) {
    %c0_i32 = arith.constant 0 : i32
    %c0_i32_0 = arith.constant 0 : i32
    %c0_i32_1 = arith.constant 0 : i32
    return %c0_i32, %c0_i32_0 : i32, i32
  }
  func.func @transform_13(%arg0: i32) -> (i32, i32, i32) {
    %c0_i32 = arith.constant 0 : i32
    %c0_i32_0 = arith.constant 0 : i32
    %c0_i32_1 = arith.constant 0 : i32
    return %arg0, %c0_i32, %c0_i32_0 : i32, i32, i32
  }
}

</mosaic_0001>

<bundles_post_ra>
// kernel: tpu_custom_call.1
= control target key start
LH: loop header
LB: loop body
LE: loop exit
PB: predicated region body
PF: predicated region fallthrough
CT: control target
= control target key end

     0   :  { %18 = vsyncpa [#allocation3], 0  ;;  %s1955_s0 = inlined_call_operand.hbm [shape: f32[64,17], index: 0, kind: input, shape index: {}]   ;;  %s1956_s1 = inlined_call_operand.hbm [shape: f32[17,32], index: 1, kind: input, shape index: {}]   ;;  %s1957_s2 = inlined_call_operand.hbm [shape: f32[1,32], index: 2, kind: input, shape index: {}]   ;;  %s1958_s3 = inlined_call_operand.hbm [shape: f32[32,64], index: 3, kind: input, shape index: {}]   ;;  %s1959_s4 = inlined_call_operand.hbm [shape: f32[1,64], index: 4, kind: input, shape index: {}]   ;;  %s1960_s5 = inlined_call_operand.hbm [shape: f32[64,128], index: 5, kind: input, shape index: {}]   ;;  %s1961_s6 = inlined_call_operand.hbm [shape: f32[1,128], index: 6, kind: input, shape index: {}]   ;;  %s1962_s7 = inlined_call_operand.hbm [shape: f32[128,64], index: 7, kind: input, shape index: {}]   ;;  %s1963_s8 = inlined_call_operand.hbm [shape: f32[1,64], index: 8, kind: input, shape index: {}]   ;;  %s1964_s9 = inlined_call_operand.hbm [shape: f32[64,32], index: 9, kind: input, shape index: {}]   ;;  %s1965_s10 = inlined_call_operand.hbm [shape: f32[1,32], index: 10, kind: input, shape index: {}]   ;;  %s1966_s11 = inlined_call_operand.hbm [shape: f32[8,32], index: 11, kind: input, shape index: {}]   ;;  %s1967_s12 = inlined_call_operand.hbm [shape: f32[8,1], index: 12, kind: input, shape index: {}]   ;;  %s1968_s13 = inlined_call_operand.hbm [shape: f32[1,8,4], index: 13, kind: output, shape index: {}]  }
   0x1   :  { %19 = vsyncpa [#allocation6], 0 }
   0x2   :  { %20 = vsyncpa [#allocation9], 0 }
   0x3   :  { %21 = vsyncpa [#allocation12], 0 }
   0x4   :  { %22 = vsyncpa [#allocation15], 0 }
   0x5   :  { %23 = vsyncpa [#allocation18], 0 }
   0x6   :  { %24 = vsyncpa [#allocation21], 0 }
   0x7   :  { %25 = vsyncpa [#allocation4], 0  ;;  %s1631_s25 = smov [#allocation5]   ;;  %s1632_s27 = smov [#allocation8]  }
   0x8   :  { %s43_s26 = sshll.u32 %s1631_s25, 4  ;;  %s65_s28 = sshll.u32 %s1632_s27, 4  ;;  %s44_s26 = int_to_ptr.vmem [resolvable:$true] %s43_s26  ;;  %s1721_s28 = int_to_ptr.vmem [resolvable:$true] %s65_s28 }
   0x9   :  { %s1307_s14 = scalar_lea.hbm %s1956_s1, 384 }
   0xa   :  { %p1308_p0 = scmp.ne.s32.totalorder %s1956_s1, %s1307_s14  ;;  %p1311_p1 = scmp.lt.u32.totalorder %s1307_s14, %s1956_s1 }
   0xc   :  { %p1313_p2 = pnand %p1311_p1, %p1308_p0 }
   0xe   :  { %1316 = shalt.err (!%p1313_p2)
}
   0xf   :  { %s1317_s19 = scalar_lea.vmem %s44_s26, 384  ;;  %p1322_p4 = scmp.lt.s32.totalorder %s44_s26, %s44_s26 }
  0x10   :  { %p1318_p3 = scmp.ne.s32.totalorder %s44_s26, %s1317_s19  ;;  %p1323_p5 = scmp.lt.s32.totalorder %s1317_s19, %s1317_s19 }
  0x12   :  { %p1324_p6 = por %p1323_p5, %p1322_p4 }
  0x14   :  { %p1325_p7 = pnand %p1324_p6, %p1318_p3 }
  0x16   :  { %1328 = shalt.err (!%p1325_p7)
}
  0x17   :  { %s1633_s20 = smov 128   ;;  %s1634_s21 = smov 8  }
  0x18   :  { %49 = dma.hbm_to_vmem [thread:$0]  %s1956_s1, 384, %s44_s26, [#allocation6], %s1633_s20, %s1633_s20, %s1634_s21  }
  0x19   :  { %s1329_s27 = scalar_lea.hbm %s1958_s3, 512 }
  0x1a   :  { %p1330_p8 = scmp.ne.s32.totalorder %s1958_s3, %s1329_s27  ;;  %p1333_p9 = scmp.lt.u32.totalorder %s1329_s27, %s1958_s3 }
  0x1c   :  { %p1335_p10 = pnand %p1333_p9, %p1330_p8 }
  0x1e   :  { %1338 = shalt.err (!%p1335_p10)
}
  0x1f   :  { %s1339_s16 = scalar_lea.vmem %s1721_s28, 512  ;;  %p1344_p12 = scmp.lt.s32.totalorder %s1721_s28, %s1721_s28 }
  0x20   :  { %p1340_p11 = scmp.ne.s32.totalorder %s1721_s28, %s1339_s16  ;;  %p1345_p13 = scmp.lt.s32.totalorder %s1339_s16, %s1339_s16 }
  0x22   :  { %p1346_p0 = por %p1345_p13, %p1344_p12 }
  0x24   :  { %p1347_p1 = pnand %p1346_p0, %p1340_p11 }
  0x26   :  { %1350 = shalt.err (!%p1347_p1)
}
  0x27   :  { %71 = dma.hbm_to_vmem [thread:$0]  %s1958_s3, 512, %s1721_s28, [#allocation9], %s1633_s20, %s1633_s20, %s1634_s21  }
  0x28   :  { %s1635_s17 = smov [#allocation11]   ;;  %s1636_s19 = smov [#allocation14]  }
  0x29   :  { %s87_s18 = sshll.u32 %s1635_s17, 4  ;;  %s109_s22 = sshll.u32 %s1636_s19, 4  ;;  %s88_s18 = int_to_ptr.vmem [resolvable:$true] %s87_s18  ;;  %s1758_s22 = int_to_ptr.vmem [resolvable:$true] %s109_s22 }
  0x2a   :  { %s1351_s25 = scalar_lea.hbm %s1960_s5, 1024 }
  0x2b   :  { %p1352_p2 = scmp.ne.s32.totalorder %s1960_s5, %s1351_s25  ;;  %p1355_p3 = scmp.lt.u32.totalorder %s1351_s25, %s1960_s5 }
  0x2d   :  { %p1357_p4 = pnand %p1355_p3, %p1352_p2 }
  0x2f   :  { %1360 = shalt.err (!%p1357_p4)
}
  0x30   :  { %s1361_s3 = scalar_lea.vmem %s88_s18, 1024  ;;  %p1366_p6 = scmp.lt.s32.totalorder %s88_s18, %s88_s18 }
  0x31   :  { %p1362_p5 = scmp.ne.s32.totalorder %s88_s18, %s1361_s3  ;;  %p1367_p7 = scmp.lt.s32.totalorder %s1361_s3, %s1361_s3 }
  0x33   :  { %p1368_p8 = por %p1367_p7, %p1366_p6 }
  0x35   :  { %p1369_p9 = pnand %p1368_p8, %p1362_p5 }
  0x37   :  { %1372 = shalt.err (!%p1369_p9)
}
  0x38   :  { %93 = dma.hbm_to_vmem [thread:$0]  %s1960_s5, 1024, %s88_s18, [#allocation12], %s1633_s20, %s1633_s20, %s1634_s21  }
  0x39   :  { %s1373_s26 = scalar_lea.hbm %s1962_s7, 2048 }
  0x3a   :  { %p1374_p10 = scmp.ne.s32.totalorder %s1962_s7, %s1373_s26  ;;  %p1377_p11 = scmp.lt.u32.totalorder %s1373_s26, %s1962_s7 }
  0x3c   :  { %p1379_p12 = pnand %p1377_p11, %p1374_p10 }
  0x3e   :  { %1382 = shalt.err (!%p1379_p12)
}
  0x3f   :  { %s1383_s25 = scalar_lea.vmem %s1758_s22, 2048  ;;  %p1388_p0 = scmp.lt.s32.totalorder %s1758_s22, %s1758_s22 }
  0x40   :  { %p1384_p13 = scmp.ne.s32.totalorder %s1758_s22, %s1383_s25  ;;  %p1389_p1 = scmp.lt.s32.totalorder %s1383_s25, %s1383_s25 }
  0x42   :  { %p1390_p2 = por %p1389_p1, %p1388_p0 }
  0x44   :  { %p1391_p3 = pnand %p1390_p2, %p1384_p13 }
  0x46   :  { %1394 = shalt.err (!%p1391_p3)
}
  0x47   :  { %115 = dma.hbm_to_vmem [thread:$0]  %s1962_s7, 2048, %s1758_s22, [#allocation15], %s1633_s20, %s1633_s20, %s1634_s21  }
  0x48   :  { %s1637_s27 = smov [#allocation17]   ;;  %s1638_s30 = smov [#allocation20]  }
  0x49   :  { %s131_s29 = sshll.u32 %s1637_s27, 4  ;;  %s154_s14 = sshll.u32 %s1638_s30, 4  ;;  %s132_s29 = int_to_ptr.vmem [resolvable:$true] %s131_s29  ;;  %s155_s14 = int_to_ptr.vmem [resolvable:$true] %s154_s14 }
  0x4a   :  { %s1395_s15 = scalar_lea.hbm %s1964_s9, 1024 }
  0x4b   :  { %p1396_p4 = scmp.ne.s32.totalorder %s1964_s9, %s1395_s15  ;;  %p1399_p5 = scmp.lt.u32.totalorder %s1395_s15, %s1964_s9 }
  0x4d   :  { %p1401_p6 = pnand %p1399_p5, %p1396_p4 }
  0x4f   :  { %1404 = shalt.err (!%p1401_p6)
}
  0x50   :  { %s1405_s7 = scalar_lea.vmem %s132_s29, 1024  ;;  %p1410_p8 = scmp.lt.s32.totalorder %s132_s29, %s132_s29 }
  0x51   :  { %p1406_p7 = scmp.ne.s32.totalorder %s132_s29, %s1405_s7  ;;  %p1411_p9 = scmp.lt.s32.totalorder %s1405_s7, %s1405_s7 }
  0x53   :  { %p1412_p10 = por %p1411_p9, %p1410_p8 }
  0x55   :  { %p1413_p11 = pnand %p1412_p10, %p1406_p7 }
  0x57   :  { %1416 = shalt.err (!%p1413_p11)
}
  0x58   :  { %137 = dma.hbm_to_vmem [thread:$0]  %s1964_s9, 1024, %s132_s29, [#allocation18], %s1633_s20, %s1633_s20, %s1634_s21  }
  0x59   :  { %s1417_s25 = scalar_lea.hbm %s1966_s11, 128 }
  0x5a   :  { %p1418_p12 = scmp.ne.s32.totalorder %s1966_s11, %s1417_s25  ;;  %p1421_p13 = scmp.lt.u32.totalorder %s1417_s25, %s1966_s11 }
  0x5c   :  { %p1423_p0 = pnand %p1421_p13, %p1418_p12 }
  0x5e   :  { %1426 = shalt.err (!%p1423_p0)
}
  0x5f   :  { %s1427_s3 = scalar_lea.vmem %s155_s14, 128  ;;  %p1432_p2 = scmp.lt.s32.totalorder %s155_s14, %s155_s14 }
  0x60   :  { %p1428_p1 = scmp.ne.s32.totalorder %s155_s14, %s1427_s3  ;;  %p1433_p3 = scmp.lt.s32.totalorder %s1427_s3, %s1427_s3 }
  0x62   :  { %p1434_p4 = por %p1433_p3, %p1432_p2 }
  0x64   :  { %p1435_p5 = pnand %p1434_p4, %p1428_p1 }
  0x66   :  { %1438 = shalt.err (!%p1435_p5)
}
  0x67   :  { %157 = dma.hbm_to_vmem [thread:$0]  %s1966_s11, 128, %s155_s14, [#allocation21]  }
  0x68   :  { %s1639_s28 = smov [#allocation2]   ;;  %s1640_s16 = smov [#allocation7]  }
  0x69   :  { %s31_s15 = sshll.u32 %s1639_s28, 4  ;;  %s56_s1 = sshll.u32 %s1640_s16, 4  ;;  %s32_s15 = int_to_ptr.vmem [resolvable:$true] %s31_s15  ;;  %s57_s1 = int_to_ptr.vmem [resolvable:$true] %s56_s1 }
  0x6a   :  { %s1439_s7 = scalar_lea.hbm %s1955_s0, 1024 }
  0x6b   :  { %p1440_p6 = scmp.ne.s32.totalorder %s1955_s0, %s1439_s7  ;;  %p1443_p7 = scmp.lt.u32.totalorder %s1439_s7, %s1955_s0 }
  0x6d   :  { %p1445_p8 = pnand %p1443_p7, %p1440_p6 }
  0x6f   :  { %1448 = shalt.err (!%p1445_p8)
}
  0x70   :  { %s1449_s11 = scalar_lea.vmem %s32_s15, 1024  ;;  %p1454_p10 = scmp.lt.s32.totalorder %s32_s15, %s32_s15 }
  0x71   :  { %p1450_p9 = scmp.ne.s32.totalorder %s32_s15, %s1449_s11  ;;  %p1455_p11 = scmp.lt.s32.totalorder %s1449_s11, %s1449_s11 }
  0x73   :  { %p1456_p12 = por %p1455_p11, %p1454_p10 }
  0x75   :  { %p1457_p13 = pnand %p1456_p12, %p1450_p9 }
  0x77   :  { %1460 = shalt.err (!%p1457_p13)
}
  0x78   :  { %37 = dma.hbm_to_vmem [thread:$0]  %s1955_s0, 1024, %s32_s15, [#allocation3], %s1633_s20, %s1633_s20, %s1634_s21  }
  0x79   :  { %s1461_s27 = scalar_lea.hbm %s1957_s2, 16 }
  0x7a   :  { %p1462_p0 = scmp.ne.s32.totalorder %s1957_s2, %s1461_s27  ;;  %p1465_p1 = scmp.lt.u32.totalorder %s1461_s27, %s1957_s2 }
  0x7c   :  { %p1467_p2 = pnand %p1465_p1, %p1462_p0 }
  0x7e   :  { %1470 = shalt.err (!%p1467_p2)
}
  0x7f   :  { %s1471_s28 = scalar_lea.vmem %s57_s1, 16  ;;  %s1475_s16 = scalar_lea.vmem %s57_s1, 32 }
  0x80   :  { %p1472_p3 = scmp.ne.s32.totalorder %s57_s1, %s1471_s28  ;;  %p1476_p4 = scmp.lt.s32.totalorder %s57_s1, %s57_s1 }
  0x81   :  { %p1477_p5 = scmp.lt.s32.totalorder %s1475_s16, %s1471_s28 }
  0x83   :  { %p1478_p6 = por %p1477_p5, %p1476_p4 }
  0x85   :  { %p1479_p7 = pnand %p1478_p6, %p1472_p3 }
  0x87   :  { %1482 = shalt.err (!%p1479_p7)
}
  0x88   :  { %59 = dma.hbm_to_vmem [thread:$0]  %s1957_s2, 16, %s57_s1, [#allocation6]  }
  0x89   :  { %s1641_s21 = smov [#allocation10]   ;;  %s1642_s26 = smov [#allocation13]  }
  0x8a   :  { %s78_s15 = sshll.u32 %s1641_s21, 4  ;;  %s100_s17 = sshll.u32 %s1642_s26, 4  ;;  %s79_s15 = int_to_ptr.vmem [resolvable:$true] %s78_s15  ;;  %s101_s17 = int_to_ptr.vmem [resolvable:$true] %s100_s17 }
  0x8b   :  { %s1483_s19 = scalar_lea.hbm %s1959_s4, 16 }
  0x8c   :  { %p1484_p8 = scmp.ne.s32.totalorder %s1959_s4, %s1483_s19  ;;  %p1487_p9 = scmp.lt.u32.totalorder %s1483_s19, %s1959_s4 }
  0x8e   :  { %p1489_p10 = pnand %p1487_p9, %p1484_p8 }
  0x90   :  { %1492 = shalt.err (!%p1489_p10)
}
  0x91   :  { %s1493_s2 = scalar_lea.vmem %s79_s15, 16  ;;  %s1497_s1 = scalar_lea.vmem %s79_s15, 32 }
  0x92   :  { %p1494_p11 = scmp.ne.s32.totalorder %s79_s15, %s1493_s2  ;;  %p1498_p12 = scmp.lt.s32.totalorder %s79_s15, %s79_s15 }
  0x93   :  { %p1499_p13 = scmp.lt.s32.totalorder %s1497_s1, %s1493_s2 }
  0x95   :  { %p1500_p0 = por %p1499_p13, %p1498_p12 }
  0x97   :  { %p1501_p1 = pnand %p1500_p0, %p1494_p11 }
  0x99   :  { %1504 = shalt.err (!%p1501_p1)
}
  0x9a   :  { %81 = dma.hbm_to_vmem [thread:$0]  %s1959_s4, 16, %s79_s15, [#allocation9]  }
  0x9b   :  { %s1505_s30 = scalar_lea.hbm %s1961_s6, 16 }
  0x9c   :  { %p1506_p2 = scmp.ne.s32.totalorder %s1961_s6, %s1505_s30  ;;  %p1509_p3 = scmp.lt.u32.totalorder %s1505_s30, %s1961_s6 }
  0x9e   :  { %p1511_p4 = pnand %p1509_p3, %p1506_p2 }
  0xa0   :  { %1514 = shalt.err (!%p1511_p4)
}
  0xa1   :  { %s1515_s16 = scalar_lea.vmem %s101_s17, 16  ;;  %s1519_s0 = scalar_lea.vmem %s101_s17, 32 }
  0xa2   :  { %p1516_p5 = scmp.ne.s32.totalorder %s101_s17, %s1515_s16  ;;  %p1520_p6 = scmp.lt.s32.totalorder %s101_s17, %s101_s17 }
  0xa3   :  { %p1521_p7 = scmp.lt.s32.totalorder %s1519_s0, %s1515_s16 }
  0xa5   :  { %p1522_p8 = por %p1521_p7, %p1520_p6 }
  0xa7   :  { %p1523_p9 = pnand %p1522_p8, %p1516_p5 }
  0xa9   :  { %1526 = shalt.err (!%p1523_p9)
}
  0xaa   :  { %103 = dma.hbm_to_vmem [thread:$0]  %s1961_s6, 16, %s101_s17, [#allocation12]  }
  0xab   :  { %s1643_s21 = smov [#allocation16]   ;;  %s1644_s26 = smov [#allocation19]  }
  0xac   :  { %s122_s15 = sshll.u32 %s1643_s21, 4  ;;  %s144_s7 = sshll.u32 %s1644_s26, 4  ;;  %s123_s15 = int_to_ptr.vmem [resolvable:$true] %s122_s15  ;;  %s145_s7 = int_to_ptr.vmem [resolvable:$true] %s144_s7 }
  0xad   :  { %s1527_s23 = scalar_lea.hbm %s1963_s8, 16 }
  0xae   :  { %p1528_p10 = scmp.ne.s32.totalorder %s1963_s8, %s1527_s23  ;;  %p1531_p11 = scmp.lt.u32.totalorder %s1527_s23, %s1963_s8 }
  0xb0   :  { %p1533_p12 = pnand %p1531_p11, %p1528_p10 }
  0xb2   :  { %1536 = shalt.err (!%p1533_p12)
}
  0xb3   :  { %s1537_s6 = scalar_lea.vmem %s123_s15, 16  ;;  %s1541_s17 = scalar_lea.vmem %s123_s15, 32 }
  0xb4   :  { %p1538_p13 = scmp.ne.s32.totalorder %s123_s15, %s1537_s6  ;;  %p1542_p0 = scmp.lt.s32.totalorder %s123_s15, %s123_s15 }
  0xb5   :  { %p1543_p1 = scmp.lt.s32.totalorder %s1541_s17, %s1537_s6 }
  0xb7   :  { %p1544_p2 = por %p1543_p1, %p1542_p0 }
  0xb9   :  { %p1545_p3 = pnand %p1544_p2, %p1538_p13 }
  0xbb   :  { %1548 = shalt.err (!%p1545_p3)
}
  0xbc   :  { %125 = dma.hbm_to_vmem [thread:$0]  %s1963_s8, 16, %s123_s15, [#allocation15]  }
  0xbd   :  { %s1549_s27 = scalar_lea.hbm %s1965_s10, 16 }
  0xbe   :  { %p1550_p4 = scmp.ne.s32.totalorder %s1965_s10, %s1549_s27  ;;  %p1553_p5 = scmp.lt.u32.totalorder %s1549_s27, %s1965_s10 }
  0xc0   :  { %p1555_p6 = pnand %p1553_p5, %p1550_p4 }
  0xc2   :  { %1558 = shalt.err (!%p1555_p6)
}
  0xc3   :  { %s1559_s28 = scalar_lea.vmem %s145_s7, 16  ;;  %s1563_s16 = scalar_lea.vmem %s145_s7, 32 }
  0xc4   :  { %p1560_p7 = scmp.ne.s32.totalorder %s145_s7, %s1559_s28  ;;  %p1564_p8 = scmp.lt.s32.totalorder %s145_s7, %s145_s7 }
  0xc5   :  { %p1565_p9 = scmp.lt.s32.totalorder %s1563_s16, %s1559_s28 }
  0xc7   :  { %p1566_p10 = por %p1565_p9, %p1564_p8 }
  0xc9   :  { %p1567_p11 = pnand %p1566_p10, %p1560_p7 }
  0xcb   :  { %1570 = shalt.err (!%p1567_p11)
}
  0xcc   :  { %147 = dma.hbm_to_vmem [thread:$0]  %s1965_s10, 16, %s145_s7, [#allocation18]  }
  0xcd   :  { %s1645_s4 = smov [#allocation22]   ;;  %s1571_s26 = scalar_lea.hbm %s1967_s12, 128 }
  0xce   :  { %s164_s20 = sshll.u32 %s1645_s4, 4  ;;  %p1572_p12 = scmp.ne.s32.totalorder %s1967_s12, %s1571_s26  ;;  %s165_s20 = int_to_ptr.vmem [resolvable:$true] %s164_s20 }
  0xcf   :  { %p1575_p13 = scmp.lt.u32.totalorder %s1571_s26, %s1967_s12 }
  0xd1   :  { %p1577_p0 = pnand %p1575_p13, %p1572_p12 }
  0xd3   :  { %1580 = shalt.err (!%p1577_p0)
}
  0xd4   :  { %s1581_s11 = scalar_lea.vmem %s165_s20, 128  ;;  %p1586_p2 = scmp.lt.s32.totalorder %s165_s20, %s165_s20 }
  0xd5   :  { %p1582_p1 = scmp.ne.s32.totalorder %s165_s20, %s1581_s11  ;;  %p1587_p3 = scmp.lt.s32.totalorder %s1581_s11, %s1581_s11 }
  0xd7   :  { %p1588_p4 = por %p1587_p3, %p1586_p2 }
  0xd9   :  { %p1589_p5 = pnand %p1588_p4, %p1582_p1 }
  0xdb   :  { %1592 = shalt.err (!%p1589_p5)
}
  0xdc   :  { %167 = dma.hbm_to_vmem [thread:$0]  %s1967_s12, 128, %s165_s20, [#allocation21]  }
  0xdd   :  { %1615 = dma.done.wait [#allocation3], 1024  }
  0xde   :  { %1616 = vsyncadd [#allocation3], 4294966272 }
  0xdf   :  { %1617 = dma.done.wait [#allocation6], 400  }
  0xe0   :  { %1618 = vsyncadd [#allocation6], 4294966896 }
  0xe1   :  { %1619 = dma.done.wait [#allocation9], 528  }
  0xe2   :  { %1620 = vsyncadd [#allocation9], 4294966768 }
  0xe3   :  { %1621 = dma.done.wait [#allocation12], 1040  }
  0xe4   :  { %1622 = vsyncadd [#allocation12], 4294966256 }
  0xe5   :  { %1623 = dma.done.wait [#allocation15], 2064  }
  0xe6   :  { %1624 = vsyncadd [#allocation15], 4294965232 }
  0xe7   :  { %1625 = dma.done.wait [#allocation18], 1040  }
  0xe8   :  { %1626 = vsyncadd [#allocation18], 4294966256 }
  0xe9   :  { %1627 = dma.done.wait [#allocation21], 256  }
  0xea   :  { %1628 = vsyncadd [#allocation21], 4294967040  ;;  %vm225_vm0 = vcmask 138240   ;;  %v215_v0 = vld [vmem:[#allocation5] sm:$0xff]  ;;  %v216_v1 = vld [vmem:[#allocation5 + $0x8] sm:$0xff]  ;;  %vm250_vm1 = vcmask 1040384  }
  0xeb   :  { %v1222_v2 = vpack.c.bf16 %v216_v1, %v215_v0  ;;  %v207_v3 = vld [vmem:[#allocation2] sm:$0xff]  ;;  %v217_v4 = vld [vmem:[#allocation5 + $0x10] sm:$0x1]  ;;  %v208_v8 = vld [vmem:[#allocation2 + $0x8] sm:$0xff]  ;;  %vm378_vm2 = vcmask 261120   ;;  %vm531_vm3 = vcmask 523264  }
  0xec   :  { %1103 = vmatprep.mubr.msk.f32.mxu0 %vm225_vm0, %v207_v3  ;;  %v367_v5 = vld [vmem:[#allocation8] sm:$0xff]  ;;  %v368_v6 = vld [vmem:[#allocation8 + $0x8] sm:$0xff]  ;;  %v209_v9 = vld [vmem:[#allocation2 + $0x10] sm:$0xff]  ;;  %vm1647_vm4 = vmmov 0   ;;  %vm724_vm5 = vcmask 1041409   ;;  %vm726_vm6 = vcmask 1042434  }
  0xed   :  { %1223 = vmatprep.subr.bf16.mxu0 %v1222_v2  ;;  %v1226_v7 = vpack.c.bf16 %v368_v6, %v367_v5  ;;  %v210_v10 = vld [vmem:[#allocation2 + $0x18] sm:$0xff]  ;;  %v211_v11 = vld [vmem:[#allocation2 + $0x20] sm:$0xff]  ;;  %v212_v12 = vld [vmem:[#allocation2 + $0x28] sm:$0xff]  ;;  %vm728_vm7 = vcmask 1043459   ;;  %s1650_s12 = smov [#allocation23]   ;;  %vm974_vm8 = vcmask 31744  }
  0xee   :  { %1225 = vmatpush3.bf16.msra.mxu0 %v1222_v2  ;;  %v213_v13 = vld [vmem:[#allocation2 + $0x30] sm:$0xff]  ;;  %v214_v14 = vld [vmem:[#allocation2 + $0x38] sm:$0xff]  ;;  %v517_v19 = vld [vmem:[#allocation11 + $0x8] sm:$0xff]  ;;  %s982_s14 = sshll.u32 %s1650_s12, 4  ;;  %s983_s14 = int_to_ptr.vmem [resolvable:$true] %s982_s14 }
  0xef   :  { %1101 = vmatprep.subr.msk.mxu0 %vm250_vm1, %v217_v4  ;;  %1227 = vmatprep.subr.bf16.mxu1 %v1226_v7  ;;  %v369_v15 = vld [vmem:[#allocation8 + $0x10] sm:$0xff]  ;;  %v370_v16 = vld [vmem:[#allocation8 + $0x18] sm:$0xff]  ;;  %v516_v18 = vld [vmem:[#allocation11] sm:$0xff]  ;;  %s1593_s2 = scalar_lea.vmem %s983_s14, 128  ;;  %p1598_p7 = scmp.lt.s32.totalorder %s983_s14, %s983_s14 }
  0xf0   :  { %1229 = vmatpush3.bf16.msra.mxu1 %v1226_v7  ;;  %v1230_v17 = vpack.c.bf16 %v370_v16, %v369_v15  ;;  %v518_v20 = vld [vmem:[#allocation11 + $0x10] sm:$0xff]  ;;  %v1234_v21 = vpack.c.bf16 %v517_v19, %v516_v18  ;;  %v519_v22 = vld [vmem:[#allocation11 + $0x18] sm:$0xff]  ;;  %v520_v24 = vld [vmem:[#allocation11 + $0x20] sm:$0xff]  ;;  %v1646_v19 = vmov 0.0|0.0   ;;  %p1594_p6 = scmp.ne.s32.totalorder %s983_s14, %s1593_s2  ;;  %p1599_p8 = scmp.lt.s32.totalorder %s1593_s2, %s1593_s2 }
  0xf1   :  { %v1238_v23 = vpack.c.bf16 %v519_v22, %v518_v20  ;;  %v521_v25 = vld [vmem:[#allocation11 + $0x28] sm:$0xff]  ;;  %v997_v27 = vld [vmem:[#allocation7] ss:$0 sm:$0xff]  ;;  %v522_v52 = vld [vmem:[#allocation11 + $0x30] sm:$0xff] }
  0xf2   :  { %1102 = vmatpush3.msk.msra.mxu0 %vm250_vm1, %v217_v4  ;;  %1231 = vmatprep.subr.bf16.mxu1 %v1230_v17  ;;  %v1242_v26 = vpack.c.bf16 %v521_v25, %v520_v24  ;;  %v523_v53 = vld [vmem:[#allocation11 + $0x38] sm:$0xff]  ;;  %v697_v16 = vld [vmem:[#allocation14] sm:$0xff]  ;;  %v702_v24 = vld [vmem:[#allocation14 + $0x28] sm:$0xff]  ;;  %p1600_p9 = por %p1599_p8, %p1598_p7 }
  0xf3   :  { %1104 = vmatmul.mubr.msk.f32.vlgmr.msra.gmra.mrb[0].mxu0 %vm225_vm0, %v208_v8  ;;  %1235 = vmatprep.subr.bf16.mxu0 %v1234_v21  ;;  %v1246_v54 = vpack.c.bf16 %v523_v53, %v522_v52  ;;  %v1007_v55 = vld [vmem:[#allocation10] ss:$0 sm:$0xff]  ;;  %v699_v20 = vld [vmem:[#allocation14 + $0x10] sm:$0xff] }
  0xf4   :  { %1106 = vmatprep.mubr.msk.f32.mxu0 %vm225_vm0, %v209_v9  ;;  %1233 = vmatpush3.bf16.msra.mxu1 %v1230_v17  ;;  %v698_v17 = vld [vmem:[#allocation14 + $0x8] sm:$0xff]  ;;  %p1601_p10 = pnand %p1600_p9, %p1594_p6 }
  0xf5   :  { %1237 = vmatpush3.bf16.msra.mxu0 %v1234_v21  ;;  %v1251_v18 = vpack.c.bf16 %v698_v17, %v697_v16  ;;  %1250 = vmatprep.subr.bf16.mxu1 %v1646_v19  ;;  %v700_v21 = vld [vmem:[#allocation14 + $0x18] sm:$0xff] }
  0xf6   :  { %1239 = vmatprep.subr.bf16.mxu0 %v1238_v23  ;;  %v1254_v22 = vpack.c.bf16 %v700_v21, %v699_v20 }
  0xf7   :  { %1107 = vmatmul.mubr.msk.f32.gmra.mrb[2].mxu0 %vm225_vm0, %v210_v10 }
  0xf8   :  { %1109 = vmatprep.mubr.msk.f32.mxu0 %vm225_vm0, %v211_v11 }
  0xf9   :  { %1241 = vmatpush3.bf16.msra.mxu0 %v1238_v23  ;;  %v701_v23 = vld [vmem:[#allocation14 + $0x20] sm:$0xff] }
  0xfa   :  { %1243 = vmatprep.subr.bf16.mxu0 %v1242_v26  ;;  %v1257_v25 = vpack.c.bf16 %v702_v24, %v701_v23 }
  0xfb   :  { %1110 = vmatmul.mubr.msk.f32.gmra.mrb[4].mxu0 %vm225_vm0, %v212_v12 }
  0xfc   :  { %1112 = vmatprep.mubr.msk.f32.mxu0 %vm225_vm0, %v213_v13 }
  0xfd   :  { %1245 = vmatpush3.bf16.msra.mxu0 %v1242_v26  ;;  %v703_v26 = vld [vmem:[#allocation14 + $0x30] sm:$0xff] }
  0xfe   :  { %1247 = vmatprep.subr.bf16.mxu0 %v1246_v54 }
  0xff   :  { %1113 = vmatmul.mubr.msk.f32.gmra.mrb[6].mxu0 %vm225_vm0, %v214_v14 }
 0x101   :  { %1249 = vmatpush3.bf16.msra.mxu0 %v1246_v54 }
 0x102   :  { %1274 = vmatprep.subr.bf16.mxu0 %v1646_v19 }
 0x1c6   :  { %v1105_v28 = vpop.f32.mrb[0].mxu0 }
 0x1c7   :  { %v326_v29 = vadd.f32 %v1105_v28, %v997_v27  ;;  %v320_v30 = vpop.f32.mrb[1].mxu0 }
 0x1c8   :  { %v321_v31 = vadd.f32 %v997_v27, %v320_v30  ;;  %v706_v30 = vld [vmem:[#allocation14 + $0x48] sm:$0xff] }
 0x1c9   :  { %v360_v34 = vmax.f32 %v326_v29, 0.0  ;;  %v705_v29 = vld [vmem:[#allocation14 + $0x40] sm:$0xff] }
 0x1ca   :  { %v359_v32 = vmax.f32 %v321_v31, 0.0  ;;  %v1108_v33 = vpop.f32.mrb[2].mxu0  ;;  %v1263_v31 = vpack.c.bf16 %v706_v30, %v705_v29 }
 0x1cb   :  { %v336_v35 = vadd.f32 %v1108_v33, %v997_v27  ;;  %v330_v36 = vpop.f32.mrb[3].mxu0  ;;  %v708_v33 = vld [vmem:[#allocation14 + $0x58] sm:$0xff] }
 0x1cc   :  { %v331_v37 = vadd.f32 %v997_v27, %v330_v36  ;;  %1123 = vmatprep.mubr.msk.f32.mxu1 %vm378_vm2, %v359_v32  ;;  %v707_v32 = vld [vmem:[#allocation14 + $0x50] sm:$0xff]  ;;  %v710_v36 = vld [vmem:[#allocation14 + $0x68] sm:$0xff] }
 0x1cd   :  { %1124 = vmatmul.mubr.msk.f32.vlgmr.msra.gmra.mrb[0].mxu1 %vm378_vm2, %v360_v34  ;;  %v362_v40 = vmax.f32 %v336_v35, 0.0  ;;  %v1266_v34 = vpack.c.bf16 %v708_v33, %v707_v32  ;;  %v709_v35 = vld [vmem:[#allocation14 + $0x60] sm:$0xff] }
 0x1ce   :  { %v361_v38 = vmax.f32 %v331_v37, 0.0  ;;  %v1111_v39 = vpop.f32.mrb[4].mxu0  ;;  %1252 = vmatpush3.bf16.msra.mxu1 %v1251_v18  ;;  %v1269_v37 = vpack.c.bf16 %v710_v36, %v709_v35 }
 0x1cf   :  { %v346_v41 = vadd.f32 %v1111_v39, %v997_v27  ;;  %v340_v42 = vpop.f32.mrb[5].mxu0  ;;  %1253 = vmatprep.subr.bf16.mxu1 %v1646_v19  ;;  %v712_v39 = vld [vmem:[#allocation14 + $0x78] sm:$0xff] }
 0x1d0   :  { %v341_v43 = vadd.f32 %v997_v27, %v340_v42  ;;  %1126 = vmatprep.mubr.msk.f32.mxu1 %vm378_vm2, %v361_v38  ;;  %v711_v38 = vld [vmem:[#allocation14 + $0x70] sm:$0xff]  ;;  %v802_v42 = vld [vmem:[#allocation17] sm:$0xff] }
 0x1d1   :  { %1127 = vmatmul.mubr.msk.f32.gmra.mrb[2].mxu1 %vm378_vm2, %v362_v40  ;;  %v364_v46 = vmax.f32 %v346_v41, 0.0  ;;  %v1272_v40 = vpack.c.bf16 %v712_v39, %v711_v38  ;;  %v1648_v41 = vmov 0.0  }
 0x1d2   :  { %v363_v44 = vmax.f32 %v341_v43, 0.0  ;;  %v1114_v45 = vpop.f32.mrb[6].mxu0  ;;  %1255 = vmatpush3.bf16.msra.mxu1 %v1254_v22  ;;  %v803_v43 = vld [vmem:[#allocation17 + $0x8] sm:$0xff] }
 0x1d3   :  { %v356_v47 = vadd.f32 %v1114_v45, %v997_v27  ;;  %v350_v48 = vpop.f32.mrb[7].mxu0  ;;  %1256 = vmatprep.subr.bf16.mxu1 %v1646_v19  ;;  %v1275_v45 = vpack.c.bf16 %v803_v43, %v802_v42 }
 0x1d4   :  { %v351_v49 = vadd.f32 %v997_v27, %v350_v48  ;;  %1129 = vmatprep.mubr.msk.f32.mxu1 %vm378_vm2, %v363_v44  ;;  %v704_v27 = vld [vmem:[#allocation14 + $0x38] sm:$0xff]  ;;  %v806_v48 = vld [vmem:[#allocation17 + $0x20] sm:$0xff] }
 0x1d5   :  { %1130 = vmatmul.mubr.msk.f32.gmra.mrb[4].mxu1 %vm378_vm2, %v364_v46  ;;  %v366_v51 = vmax.f32 %v356_v47, 0.0  ;;  %v1260_v28 = vpack.c.bf16 %v704_v27, %v703_v26  ;;  %v804_v44 = vld [vmem:[#allocation17 + $0x10] sm:$0xff]  ;;  %v805_v46 = vld [vmem:[#allocation17 + $0x18] sm:$0xff] }
 0x1d6   :  { %v365_v50 = vmax.f32 %v351_v49, 0.0  ;;  %1258 = vmatpush3.bf16.msra.mxu1 %v1257_v25  ;;  %v1278_v47 = vpack.c.bf16 %v805_v46, %v804_v44  ;;  %v807_v49 = vld [vmem:[#allocation17 + $0x28] sm:$0xff]  ;;  %v808_v44 = vld [vmem:[#allocation17 + $0x30] sm:$0xff] }
 0x1d7   :  { %1259 = vmatprep.subr.bf16.mxu1 %v1646_v19 }
 0x1d8   :  { %1132 = vmatprep.mubr.msk.f32.mxu1 %vm378_vm2, %v365_v50  ;;  %v1281_v50 = vpack.c.bf16 %v807_v49, %v806_v48 }
 0x1d9   :  { %1133 = vmatmul.mubr.msk.f32.gmra.mrb[6].mxu1 %vm378_vm2, %v366_v51  ;;  %v1016_v51 = vld [vmem:[#allocation13] ss:$0 sm:$0xff] }
 0x1da   :  { %1261 = vmatpush3.bf16.msra.mxu1 %v1260_v28  ;;  %1195 = vmatprep.mubr.msk.f32.mxu1 %vm1647_vm4, %v1648_v41 }
 0x1db   :  { %1262 = vmatprep.subr.bf16.mxu1 %v1646_v19 }
 0x1de   :  { %1264 = vmatpush3.bf16.msra.mxu1 %v1263_v31 }
 0x1df   :  { %1265 = vmatprep.subr.bf16.mxu1 %v1646_v19 }
 0x1e2   :  { %1267 = vmatpush3.bf16.msra.mxu1 %v1266_v34 }
 0x1e3   :  { %1268 = vmatprep.subr.bf16.mxu1 %v1646_v19 }
 0x1e6   :  { %1270 = vmatpush3.bf16.msra.mxu1 %v1269_v37 }
 0x1e7   :  { %1271 = vmatprep.subr.bf16.mxu1 %v1646_v19 }
 0x1ea   :  { %1273 = vmatpush3.bf16.msra.mxu1 %v1272_v40 }
 0x2a0   :  { %v1125_v56 = vpop.f32.mrb[0].mxu1 }
 0x2a1   :  { %v475_v57 = vadd.f32 %v1125_v56, %v1007_v55  ;;  %v469_v58 = vpop.f32.mrb[1].mxu1 }
 0x2a2   :  { %v470_v59 = vadd.f32 %v1007_v55, %v469_v58 }
 0x2a3   :  { %v509_v62 = vmax.f32 %v475_v57, 0.0 }
 0x2a4   :  { %v508_v60 = vmax.f32 %v470_v59, 0.0  ;;  %v1128_v61 = vpop.f32.mrb[2].mxu1 }
 0x2a5   :  { %v485_v63 = vadd.f32 %v1128_v61, %v1007_v55  ;;  %v479_v0 = vpop.f32.mrb[3].mxu1 }
 0x2a6   :  { %v480_v1 = vadd.f32 %v1007_v55, %v479_v0  ;;  %1151 = vmatprep.mubr.msk.f32.mxu0 %vm531_vm3, %v508_v60 }
 0x2a7   :  { %1152 = vmatmul.mubr.msk.f32.vlgmr.msra.gmra.mrb[8].mxu0 %vm531_vm3, %v509_v62  ;;  %v511_v4 = vmax.f32 %v485_v63, 0.0 }
 0x2a8   :  { %v510_v2 = vmax.f32 %v480_v1, 0.0  ;;  %v1131_v3 = vpop.f32.mrb[4].mxu1  ;;  %1276 = vmatpush3.bf16.msra.mxu0 %v1275_v45  ;;  %v809_v45 = vld [vmem:[#allocation17 + $0x38] sm:$0xff] }
 0x2a9   :  { %v495_v5 = vadd.f32 %v1131_v3, %v1007_v55  ;;  %v489_v6 = vpop.f32.mrb[5].mxu1  ;;  %1277 = vmatprep.subr.bf16.mxu0 %v1646_v19  ;;  %v1284_v46 = vpack.c.bf16 %v809_v45, %v808_v44 }
 0x2aa   :  { %v490_v7 = vadd.f32 %v1007_v55, %v489_v6  ;;  %1154 = vmatprep.mubr.msk.f32.mxu0 %vm531_vm3, %v510_v2 }
 0x2ab   :  { %1155 = vmatmul.mubr.msk.f32.gmra.mrb[10].mxu0 %vm531_vm3, %v511_v4  ;;  %v513_v10 = vmax.f32 %v495_v5, 0.0 }
 0x2ac   :  { %v512_v8 = vmax.f32 %v490_v7, 0.0  ;;  %v1134_v9 = vpop.f32.mrb[6].mxu1  ;;  %1279 = vmatpush3.bf16.msra.mxu0 %v1278_v47  ;;  %v1025_v47 = vld [vmem:[#allocation16] ss:$0 sm:$0xff] }
 0x2ad   :  { %v505_v11 = vadd.f32 %v1134_v9, %v1007_v55  ;;  %v499_v12 = vpop.f32.mrb[7].mxu1  ;;  %1280 = vmatprep.subr.bf16.mxu0 %v1646_v19 }
 0x2ae   :  { %v500_v13 = vadd.f32 %v1007_v55, %v499_v12  ;;  %1157 = vmatprep.mubr.msk.f32.mxu0 %vm531_vm3, %v512_v8 }
 0x2af   :  { %1158 = vmatmul.mubr.msk.f32.gmra.mrb[12].mxu0 %vm531_vm3, %v513_v10  ;;  %v515_v15 = vmax.f32 %v505_v11, 0.0 }
 0x2b0   :  { %v514_v14 = vmax.f32 %v500_v13, 0.0  ;;  %1282 = vmatpush3.bf16.msra.mxu0 %v1281_v50 }
 0x2b1   :  { %1283 = vmatprep.subr.bf16.mxu0 %v1646_v19 }
 0x2b2   :  { %1160 = vmatprep.mubr.msk.f32.mxu0 %vm531_vm3, %v514_v14 }
 0x2b3   :  { %1161 = vmatmul.mubr.msk.f32.gmra.mrb[14].mxu0 %vm531_vm3, %v515_v15 }
 0x2b4   :  { %1214 = vmatprep.mubr.msk.f32.mxu0 %vm1647_vm4, %v1648_v41  ;;  %1285 = vmatpush3.bf16.msra.mxu0 %v1284_v46 }
 0x2b5   :  { %1217 = vmatprep.subr.mxu0 %v1648_v41 }
 0x37a   :  { %v1153_v52 = vpop.f32.mrb[8].mxu0 }
 0x37b   :  { %v628_v53 = vadd.f32 %v1153_v52, %v1016_v51  ;;  %v622_v54 = vpop.f32.mrb[9].mxu0  ;;  %v892_v52 = vld [vmem:[#allocation22] sm:$0xff] }
 0x37c   :  { %v623_v55 = vadd.f32 %v1016_v51, %v622_v54  ;;  %v1026_v54 = vld [vmem:[#allocation19] ss:$0 sm:$0xff] }
 0x37d   :  { %v662_v56 = vmax.f32 %v628_v53, 0.0  ;;  %v1649_v53 = vmov 0  }
 0x37e   :  { %v661_v57 = vmax.f32 %v623_v55, 0.0  ;;  %v1156_v58 = vpop.f32.mrb[10].mxu0  ;;  %1306 = vset.pattern.permute.xlu0 %v1649_v53 }
 0x37f   :  { %v638_v59 = vadd.f32 %v1156_v58, %v1016_v51  ;;  %v632_v60 = vpop.f32.mrb[11].mxu0  ;;  %895 = vperm.xlu0 %1306, %v892_v52  }
 0x380   :  { %v669_v61 = vmax.f32 %v661_v57, %v662_v56  ;;  %v633_v62 = vadd.f32 %v1016_v51, %v632_v60 }
 0x381   :  { %v664_v63 = vmax.f32 %v638_v59, 0.0  ;;  %v891_v59 = vld [vmem:[#allocation20] sm:$0xff] }
 0x382   :  { %v670_v0 = vrot.slane %v669_v61, 4  ;;  %v663_v1 = vmax.f32 %v633_v62, 0.0  ;;  %v1159_v2 = vpop.f32.mrb[12].mxu0 }
 0x383   :  { %v648_v3 = vadd.f32 %v1159_v2, %v1016_v51  ;;  %v642_v4 = vpop.f32.mrb[13].mxu0 }
 0x384   :  { %v671_v5 = vmax.f32 %v669_v61, %v670_v0  ;;  %v676_v6 = vmax.f32 %v663_v1, %v664_v63  ;;  %v643_v7 = vadd.f32 %v1016_v51, %v642_v4 }
 0x385   :  { %v666_v8 = vmax.f32 %v648_v3, 0.0 }
 0x386   :  { %v672_v9 = vrot.slane %v671_v5, 2  ;;  %v677_v10 = vrot.slane %v676_v6, 4  ;;  %v665_v11 = vmax.f32 %v643_v7, 0.0  ;;  %v1162_v12 = vpop.f32.mrb[14].mxu0 }
 0x387   :  { %v658_v13 = vadd.f32 %v1162_v12, %v1016_v51  ;;  %v652_v14 = vpop.f32.mrb[15].mxu0 }
 0x388   :  { %v673_v15 = vmax.f32 %v671_v5, %v672_v9  ;;  %v678_v16 = vmax.f32 %v676_v6, %v677_v10  ;;  %v683_v17 = vmax.f32 %v665_v11, %v666_v8  ;;  %v653_v18 = vadd.f32 %v1016_v51, %v652_v14 }
 0x389   :  { %v668_v19 = vmax.f32 %v658_v13, 0.0 }
 0x38a   :  { %v679_v20 = vrot.slane %v678_v16, 2  ;;  %v684_v21 = vrot.slane %v683_v17, 4  ;;  %v667_v22 = vmax.f32 %v653_v18, 0.0  ;;  %v674_v23 = vrot.slane %v673_v15, 1 }
 0x38c   :  { %v680_v24 = vmax.f32 %v678_v16, %v679_v20  ;;  %v685_v25 = vmax.f32 %v683_v17, %v684_v21  ;;  %v690_v26 = vmax.f32 %v667_v22, %v668_v19  ;;  %v675_v30 = vmax.f32 %v673_v15, %v674_v23 }
 0x38e   :  { %v681_v27 = vrot.slane %v680_v24, 1  ;;  %v686_v28 = vrot.slane %v685_v25, 2  ;;  %v691_v29 = vrot.slane %v690_v26, 4 }
 0x390   :  { %v682_v31 = vmax.f32 %v680_v24, %v681_v27  ;;  %v687_v32 = vmax.f32 %v685_v25, %v686_v28  ;;  %v692_v33 = vmax.f32 %v690_v26, %v691_v29 }
 0x392   :  { %v688_v34 = vrot.slane %v687_v32, 1  ;;  %v693_v35 = vrot.slane %v692_v33, 2  ;;  %v725_v36 = vsel %vm724_vm5, %v682_v31, %v675_v30 }
 0x394   :  { %v689_v37 = vmax.f32 %v687_v32, %v688_v34  ;;  %v694_v38 = vmax.f32 %v692_v33, %v693_v35 }
 0x396   :  { %v695_v39 = vrot.slane %v694_v38, 1  ;;  %v727_v40 = vsel %vm726_vm6, %v689_v37, %v725_v36 }
 0x398   :  { %v696_v42 = vmax.f32 %v694_v38, %v695_v39 }
 0x39a   :  { %v729_v43 = vsel %vm728_vm7, %v696_v42, %v727_v40 }
 0x39b   :  { %1196 = vmatmul.mubr.f32.vlgmr.msra.gmra.mrb[8].mxu1 %v729_v43 }
 0x3fe   :  { %v896_v60 = vpop.permute.xlu0 %895 }
 0x46e   :  { %v797_v48 = vpop.f32.mrb[8].mxu1 }
 0x46f   :  { %v798_v49 = vadd.f32 %v1025_v47, %v797_v48  ;;  %v1197_v50 = vpop.f32.mrb[9].mxu1 }
 0x471   :  { %v801_v51 = vmax.f32 %v798_v49, 0.0 }
 0x473   :  { %1215 = vmatmul.mubr.msk.f32.vlgmr.msra.gmra.mrb[16].mxu0 %vm531_vm3, %v801_v51 }
 0x474   :  { %1219 = vmatprep.mubr.msk.f32.mxu0 %vm1647_vm4, %v1648_v41 }
 0x546   :  { %v886_v55 = vpop.f32.mrb[16].mxu0 }
 0x547   :  { %v887_v56 = vadd.f32 %v1026_v54, %v886_v55  ;;  %v1216_v57 = vpop.f32.mrb[17].mxu0 }
 0x549   :  { %v890_v58 = vmax.f32 %v887_v56, 0.0 }
 0x54b   :  { %1218 = vmatpush3.xpose.msk.msra.mxu0 %vm378_vm2, %v890_v58 }
 0x54e   :  { %1220 = vmatmul.mubr.msk.f32.vlgmr.msra.gmra.mrb[18].mxu0 %vm378_vm2, %v891_v59 }
 0x621   :  { %v970_v61 = vpop.f32.mrb[18].mxu0 }
 0x622   :  { %v971_v41 = vadd.f32 %v970_v61, %v896_v60  ;;  %v1221_v62 = vpop.f32.mrb[19].mxu0 }
 0x624   :  { %975 = vst.msk [vmem:[#allocation23] sm:$0xff] %vm974_vm8, %v971_v41 }
 0x625   :  { %1604 = shalt.err (!%p1601_p10)
}
 0x626   :  { %s1605_s1 = scalar_lea.hbm %s1968_s13, 128 }
 0x627   :  { %p1606_p11 = scmp.ne.s32.totalorder %s1968_s13, %s1605_s1  ;;  %p1609_p12 = scmp.lt.u32.totalorder %s1605_s1, %s1968_s13 }
 0x629   :  { %p1611_p13 = pnand %p1609_p12, %p1606_p11 }
 0x62b   :  { %1614 = shalt.err (!%p1611_p13)
}
 0x62c   :  { %985 = dma.vmem_to_hbm [thread:$0]  %s983_s14, 128, %s1968_s13, [#allocation4]  }
 0x62d   :  { %1629 = dma.done.wait [#allocation4], 128  }
 0x62e   :  { %1630 = vsyncadd [#allocation4], 4294967168 }
 0x62f   :  { %989 = vsyncpa [#allocation3], 1 }
 0x630   :  { %990 = vsyncpa [#allocation6], 1 }
 0x631   :  { %991 = vsyncpa [#allocation9], 1 }
 0x632   :  { %992 = vsyncpa [#allocation12], 1 }
 0x633   :  { %993 = vsyncpa [#allocation15], 1 }
 0x634   :  { %994 = vsyncpa [#allocation18], 1 }
 0x635   :  { %995 = vsyncpa [#allocation21], 1 }
 0x636   :  { %996 = vsyncpa [#allocation4], 1 }

</bundles_post_ra>
